<compile_context>
chip_gen: v7x
topology: tpu7x:2x2x1
jax: 0.10.0
libtpu: 0.0.40
codegen_flags: <defaults>
</compile_context>

<pallas_src>
import functools
import math

import numpy as np

import jax
import jax.numpy as jnp
from jax.experimental import pallas as pl
from jax.experimental.pallas import tpu as pltpu


def _mha_kernel(x_ref, w_ref, mask_ref, a_ref, v_ref, *, chunk_dim):
    """Per-batch step.  x:(1,V,C*D)  w:(C*D,3*C*D)  mask:(C*D,C*H*V)."""
    CD = chunk_dim                                        # C * D
    x = x_ref[0]                                          # (V, C*D)
    w = w_ref[...]                                        # VMEM-resident

    # Single fused, chunk-block-diagonal projection: q | k | v in one MXU pass.
    qkv = jnp.dot(x, w, preferred_element_type=jnp.float32)        # (V, 3*C*D)

    q = qkv[:, :CD]                                       # already scaled by 1/sqrt(dk)
    k = qkv[:, CD:2 * CD]
    v_ref[0] = qkv[:, 2 * CD:].astype(v_ref.dtype)        # lane-dense (V, C*D) store

    # One k transpose for the whole step, then (chunk, head)-block-diagonal K
    # via a precomputed 0/1 f32 mask multiply.  Columns ordered (c, h, j).
    n_rep = mask_ref.shape[1] // k.shape[0]               # = C * H (static)
    k_bd = jnp.tile(k.T, (1, n_rep)) * mask_ref[...]      # (C*D, C*H*V)

    # All chunks' and all heads' logits in one matmul, emitted lane-dense.
    a = jnp.dot(q, k_bd, preferred_element_type=jnp.float32)       # (V, C*H*V)
    a_ref[0] = a.astype(a_ref.dtype)


def make_chunk_head_mask(num_chunks, num_heads, num_v, dk, dtype=jnp.float32):
    """0/1 mask M[(c,d), (c',h,j)] = 1 iff c == c' and d // dk == h.  Built once."""
    C, H, V = num_chunks, num_heads, num_v
    D = H * dk
    r = np.arange(C * D)[:, None]
    col = np.arange(C * H * V)[None, :]
    keep = ((r // D) == (col // (H * V))) & (((r % D) // dk) == ((col % (H * V)) // V))
    return jnp.asarray(keep, dtype=dtype)                 # (C*D, C*H*V)


def fuse_mha_weights(wq, wk, wv, *, num_heads, num_chunks):
    """One-time prep: chunk-block-diagonal fused (C*D, 3*C*D) weight with the
    1/sqrt(dk) query scale folded into the q block."""
    D = wq.shape[0]
    dk = D // num_heads
    eye_c = jnp.eye(num_chunks, dtype=wq.dtype)
    blocks = [
        jnp.kron(eye_c, wq / math.sqrt(dk)),              # (C*D, C*D)
        jnp.kron(eye_c, wk),
        jnp.kron(eye_c, wv),
    ]
    return jnp.concatenate(blocks, axis=1)                # (C*D, 3*C*D)


@functools.partial(jax.jit, static_argnames=("num_heads",))
def multi_head_attention_fwd(x, w_fused, mask, *, num_heads):
    """x: (B, V, C, D) f32.  Returns (A: (B, H, C, V, V), v: (B, V, C, D))."""
    B, V, C, D = x.shape
    H = num_heads
    CD = C * D
    x2 = x.reshape(B, V, CD)                              # free reshape; cols = (c, d)

    kernel = functools.partial(_mha_kernel, chunk_dim=CD)

    a_slab, v2 = pl.pallas_call(
        kernel,
        out_shape=(
            jax.ShapeDtypeStruct((B, V, C * H * V), jnp.float32),   # lane-dense logits
            jax.ShapeDtypeStruct((B, V, CD), jnp.float32),          # lane-dense v
        ),
        grid_spec=pltpu.PrefetchScalarGridSpec(
            num_scalar_prefetch=0,
            grid=(B,),
            in_specs=[
                pl.BlockSpec((1, V, CD), lambda b: (b, 0, 0)),
                pl.BlockSpec((CD, 3 * CD), lambda b: (0, 0)),        # stays in VMEM
                pl.BlockSpec((CD, C * H * V), lambda b: (0, 0)),     # stays in VMEM
            ],
            out_specs=[
                pl.BlockSpec((1, V, C * H * V), lambda b: (b, 0, 0)),
                pl.BlockSpec((1, V, CD), lambda b: (b, 0, 0)),
            ],
        ),
        compiler_params=pltpu.CompilerParams(
            dimension_semantics=("parallel",),            # B=2 -> both TCs busy on v7x
        ),
    )(x2, w_fused, mask)

    # Layout plumbing back to the PyTorch output convention; fuses inside this jit.
    A = a_slab.reshape(B, V, C, H, V).transpose(0, 3, 2, 1, 4)      # (B, H, C, V, V)
    v = v2.reshape(B, V, C, D)
    return A, v


def _xavier_uniform(key, shape, dtype=jnp.float32):
    fan_in, fan_out = shape
    bound = math.sqrt(6.0 / (fan_in + fan_out))
    return jax.random.uniform(key, shape, dtype, minval=-bound, maxval=bound)


if __name__ == "__main__":
    # Shapes consistent with the module's forward: x is (bsz, V, num_chunks, hidden_dim)
    B, V, C, D = 2, 16, 4, 32
    num_heads = 4
    dk = D // num_heads

    key = jax.random.PRNGKey(0)
    kx, kq, kk, kv = jax.random.split(key, 4)

    x = jax.random.normal(kx, (B, V, C, D), dtype=jnp.float32)
    Wq = _xavier_uniform(kq, (D, D))
    Wk = _xavier_uniform(kk, (D, D))
    Wv = _xavier_uniform(kv, (D, D))

    # One-time weight / mask prep (hoisted out of the per-call path).
    w_fused = fuse_mha_weights(Wq, Wk, Wv, num_heads=num_heads, num_chunks=C)
    mask = make_chunk_head_mask(C, num_heads, V, dk)

    A, v = multi_head_attention_fwd(x, w_fused, mask, num_heads=num_heads)
    A = jax.block_until_ready(A)
    v = jax.block_until_ready(v)

    # Pure-JAX reference (mirrors the PyTorch forward; dropout is unused there).
    q_ref = (x @ Wq).reshape(B, V, C, num_heads, dk) / math.sqrt(dk)
    k_ref = (x @ Wk).reshape(B, V, C, num_heads, dk)
    v_ref = x @ Wv
    A_ref = jnp.einsum("bqchd,bkchd->bhcqk", q_ref, k_ref)

    assert A.shape == (B, num_heads, C, V, V)
    assert v.shape == (B, V, C, D)
    assert jnp.allclose(A, A_ref, atol=1e-4, rtol=1e-4)
    assert jnp.allclose(v, v_ref, atol=1e-4, rtol=1e-4)

    print("KERNEL_OK")
</pallas_src>

<mosaic_0001>
module attributes {stable_mosaic.version = 11 : i64} {
  func.func @_mha_kernel(%arg0: i32, %arg1: memref<1x16x128xf32, #tpu.memory_space<vmem>>, %arg2: memref<128x384xf32, #tpu.memory_space<vmem>>, %arg3: memref<128x256xf32, #tpu.memory_space<vmem>>, %arg4: memref<1x16x256xf32, #tpu.memory_space<vmem>>, %arg5: memref<1x16x128xf32, #tpu.memory_space<vmem>>) attributes {dimension_semantics = [#tpu.dimension_semantics<parallel>], iteration_bounds = array<i64: 2>, scalar_prefetch = 0 : i64, scratch_operands = 0 : i64, tpu.core_type = #tpu.core_type<tc>, window_params = [{transform_indices = @transform_0, window_bounds = array<i64: 1, 16, 128>}, {pipeline_mode = #tpu.pipeline_mode<synchronous>, transform_indices = @transform_1, window_bounds = array<i64: 128, 384>}, {pipeline_mode = #tpu.pipeline_mode<synchronous>, transform_indices = @transform_2, window_bounds = array<i64: 128, 256>}, {transform_indices = @transform_3, window_bounds = array<i64: 1, 16, 256>}, {transform_indices = @transform_4, window_bounds = array<i64: 1, 16, 128>}]} {
    %c0 = arith.constant 0 : index
    %c0_0 = arith.constant 0 : index
    %c0_1 = arith.constant 0 : index
    %0 = vector.load %arg1[%c0, %c0_0, %c0_1] : memref<1x16x128xf32, #tpu.memory_space<vmem>>, vector<1x16x128xf32>
    %1 = vector.shape_cast %0 : vector<1x16x128xf32> to vector<16x128xf32>
    %c0_2 = arith.constant 0 : index
    %c0_3 = arith.constant 0 : index
    %2 = vector.load %arg2[%c0_2, %c0_3] : memref<128x384xf32, #tpu.memory_space<vmem>>, vector<128x384xf32>
    %cst = arith.constant dense<0.000000e+00> : vector<16x384xf32>
    %3 = tpu.matmul %1, %2, %cst {dimension_numbers = #tpu.dot_dimension_numbers<[1], [0], [0], [1], [0, 0, 1, 1], [], []>} : vector<16x128xf32>, vector<128x384xf32>, vector<16x384xf32> -> vector<16x384xf32>
    %4 = vector.extract_strided_slice %3 {offsets = [0, 0], sizes = [16, 128], strides = [1, 1]} : vector<16x384xf32> to vector<16x128xf32>
    %5 = vector.extract_strided_slice %3 {offsets = [0, 128], sizes = [16, 128], strides = [1, 1]} : vector<16x384xf32> to vector<16x128xf32>
    %6 = vector.extract_strided_slice %3 {offsets = [0, 256], sizes = [16, 128], strides = [1, 1]} : vector<16x384xf32> to vector<16x128xf32>
    %c0_4 = arith.constant 0 : index
    %c0_5 = arith.constant 0 : index
    %c0_6 = arith.constant 0 : index
    %7 = vector.load %arg5[%c0_4, %c0_5, %c0_6] : memref<1x16x128xf32, #tpu.memory_space<vmem>>, vector<1x16x128xf32>
    %8 = vector.shape_cast %7 : vector<1x16x128xf32> to vector<16x128xf32>
    %9 = vector.shape_cast %6 : vector<16x128xf32> to vector<1x16x128xf32>
    tpu.vector_store %arg5[%c0_4, %c0_5, %c0_6], %9 {strides = array<i32>} : memref<1x16x128xf32, #tpu.memory_space<vmem>>, vector<1x16x128xf32>,
    %10 = tpu.transpose %5, [1, 0] : vector<16x128xf32> -> vector<128x16xf32>
    %11 = tpu.concatenate %10, %10, %10, %10, %10, %10, %10, %10, %10, %10, %10, %10, %10, %10, %10, %10 in 1 : vector<128x16xf32>, vector<128x16xf32>, vector<128x16xf32>, vector<128x16xf32>, vector<128x16xf32>, vector<128x16xf32>, vector<128x16xf32>, vector<128x16xf32>, vector<128x16xf32>, vector<128x16xf32>, vector<128x16xf32>, vector<128x16xf32>, vector<128x16xf32>, vector<128x16xf32>, vector<128x16xf32>, vector<128x16xf32> -> vector<128x256xf32>
    %c0_7 = arith.constant 0 : index
    %c0_8 = arith.constant 0 : index
    %12 = vector.load %arg3[%c0_7, %c0_8] : memref<128x256xf32, #tpu.memory_space<vmem>>, vector<128x256xf32>
    %13 = arith.mulf %11, %12 : vector<128x256xf32>
    %cst_9 = arith.constant dense<0.000000e+00> : vector<16x256xf32>
    %14 = tpu.matmul %4, %13, %cst_9 {dimension_numbers = #tpu.dot_dimension_numbers<[1], [0], [0], [1], [0, 0, 1, 1], [], []>} : vector<16x128xf32>, vector<128x256xf32>, vector<16x256xf32> -> vector<16x256xf32>
    %c0_10 = arith.constant 0 : index
    %c0_11 = arith.constant 0 : index
    %c0_12 = arith.constant 0 : index
    %15 = vector.load %arg4[%c0_10, %c0_11, %c0_12] : memref<1x16x256xf32, #tpu.memory_space<vmem>>, vector<1x16x256xf32>
    %16 = vector.shape_cast %15 : vector<1x16x256xf32> to vector<16x256xf32>
    %17 = vector.shape_cast %14 : vector<16x256xf32> to vector<1x16x256xf32>
    tpu.vector_store %arg4[%c0_10, %c0_11, %c0_12], %17 {strides = array<i32>} : memref<1x16x256xf32, #tpu.memory_space<vmem>>, vector<1x16x256xf32>,
    return
  }
  func.func @transform_0(%arg0: i32) -> (i32, i32, i32) {
    %c0_i32 = arith.constant 0 : i32
    %c0_i32_0 = arith.constant 0 : i32
    %c0_i32_1 = arith.constant 0 : i32
    return %arg0, %c0_i32, %c0_i32_0 : i32, i32, i32
  }
  func.func @transform_1(%arg0: i32) -> (i32, i32) {
    %c0_i32 = arith.constant 0 : i32
    %c0_i32_0 = arith.constant 0 : i32
    %c0_i32_1 = arith.constant 0 : i32
    return %c0_i32, %c0_i32_0 : i32, i32
  }
  func.func @transform_2(%arg0: i32) -> (i32, i32) {
    %c0_i32 = arith.constant 0 : i32
    %c0_i32_0 = arith.constant 0 : i32
    %c0_i32_1 = arith.constant 0 : i32
    return %c0_i32, %c0_i32_0 : i32, i32
  }
  func.func @transform_3(%arg0: i32) -> (i32, i32, i32) {
    %c0_i32 = arith.constant 0 : i32
    %c0_i32_0 = arith.constant 0 : i32
    %c0_i32_1 = arith.constant 0 : i32
    return %arg0, %c0_i32, %c0_i32_0 : i32, i32, i32
  }
  func.func @transform_4(%arg0: i32) -> (i32, i32, i32) {
    %c0_i32 = arith.constant 0 : i32
    %c0_i32_0 = arith.constant 0 : i32
    %c0_i32_1 = arith.constant 0 : i32
    return %arg0, %c0_i32, %c0_i32_0 : i32, i32, i32
  }
}

</mosaic_0001>

<bundles_post_ra>
// kernel: multi_head_attention_fwd.1
= control target key start
LH: loop header
LB: loop body
LE: loop exit
PB: predicated region body
PF: predicated region fallthrough
CT: control target
= control target key end

     0   :  { %10 = vsyncpa [#allocation3], 0  ;;  %s2095_s0 = inlined_call_operand.vmem [shape: f32[2,16,128], index: 0, kind: input, shape index: {}]   ;;  %s2096_s1 = inlined_call_operand.hbm [shape: f32[128,384], index: 1, kind: input, shape index: {}]   ;;  %s2097_s2 = inlined_call_operand.hbm [shape: f32[128,256], index: 2, kind: input, shape index: {}]   ;;  %s2098_s3 = inlined_call_operand.vmem [shape: f32[2,16,256], index: 3, kind: output, shape index: {0}]   ;;  %s2099_s4 = inlined_call_operand.vmem [shape: f32[2,16,128], index: 4, kind: output, shape index: {1}]  }
   0x1   :  { %11 = vsyncpa [#allocation5], 0  ;;  %s1524_s15 = smov 0  }
   0x2 LB: > { %s1485_s16 = smov [#allocation2]   ;;  %s1530_s18 = sadd.s32 4294967295, %s1483_s15   ;;  %s1483_s15 = sphi %s1524_s15, %s17_s15  }
   0x3   : > { %s154_s17 = sshll.u32 %s1485_s16, 4  ;;  %p1205_p0 = scmp.ge.s32.totalorder %s1483_s15, 1  ;;  %s155_s17 = int_to_ptr.vmem [resolvable:$true] %s154_s17 }
   0x4   : > { %p142_p1 = scmp.lt.s32.totalorder %s1483_s15, 3  ;;  %p2100_p3 = scmp.eq.s32.totalorder %s1530_s18, 0 }
   0x5   : > { %s1486_s20 = smov [#allocation4]   ;;  %s1413_s25 = scalar_lea.hbm %s2096_s1, 6144 }
   0x6   : > { %p1534_p2 = pnand %p1205_p0, %p142_p1  ;;  %s167_s21 = sshll.u32 %s1486_s20, 4  ;;  %s1547_s21 = int_to_ptr.vmem [resolvable:$true] %s167_s21 }
   0x7   : > { %p1414_p6 = scmp.ne.s32.totalorder %s2096_s1, %s1413_s25  ;;  %p1420_p10 = scmp.lt.u32.totalorder %s1413_s25, %s2096_s1 }
   0x8   : > { %s2102_s19 = scalar_select %p1534_p2, 1, 0 }
   0x9   : > { %p1380_p4 = pneg %p1534_p2 }
   0xb   : > { %p1543_p5 = pnand %p2100_p3, %p1380_p4 }
   0xd   : > { %p1415_p7 = pneg %p1543_p5 }
   0xf   : > { %p1416_p8 = pnand %p1415_p7, %p1414_p6 }
  0x11   : > { %p1417_p9 = pneg %p1416_p8 }
  0x13   : > { %p1422_p11 = pnand %p1420_p10, %p1417_p9 }
  0x15   : > { %1425 = shalt.err (!%p1422_p11)
}
  0x16   : > { %s1426_s30 = scalar_lea.vmem %s155_s17, 6144  ;;  %p1434_p1 = scmp.lt.s32.totalorder %s155_s17, %s155_s17 }
  0x17   : > { %p1427_p12 = scmp.ne.s32.totalorder %s155_s17, %s1426_s30  ;;  %p1435_p4 = scmp.lt.s32.totalorder %s1426_s30, %s1426_s30 }
  0x19   : > { %p1429_p13 = pnand %p1427_p12, %p1415_p7  ;;  %p1436_p3 = por %p1435_p4, %p1434_p1 }
  0x1b   : > { %p1430_p0 = pneg %p1429_p13 }
  0x1d   : > { %p1437_p2 = pnand %p1436_p3, %p1430_p0 }
  0x1f   : > { %1440 = shalt.err (!%p1437_p2)
}
  0x20   : > { %s1487_s5 = smov 384   ;;  %s1488_s6 = smov 24  }
  0x21   : > { %1383 = dma.hbm_to_vmem [thread:$0]  (!%p1543_p5), %s2096_s1, 6144, %s155_s17, [#allocation3], %s1487_s5, %s1487_s5, %s1488_s6  }
  0x22   : > { %s1441_s11 = scalar_lea.hbm %s2097_s2, 4096 }
  0x23   : > { %p1442_p6 = scmp.ne.s32.totalorder %s2097_s2, %s1441_s11  ;;  %p1448_p8 = scmp.lt.u32.totalorder %s1441_s11, %s2097_s2 }
  0x25   : > { %p1444_p2 = pnand %p1442_p6, %p1415_p7 }
  0x27   : > { %p1445_p3 = pneg %p1444_p2 }
  0x29   : > { %p1450_p9 = pnand %p1448_p8, %p1445_p3 }
  0x2b   : > { %1453 = shalt.err (!%p1450_p9)
}
  0x2c   : > { %s1454_s17 = scalar_lea.vmem %s1547_s21, 4096  ;;  %p1462_p13 = scmp.lt.s32.totalorder %s1547_s21, %s1547_s21 }
  0x2d   : > { %p1455_p10 = scmp.ne.s32.totalorder %s1547_s21, %s1454_s17  ;;  %p1463_p0 = scmp.lt.s32.totalorder %s1454_s17, %s1454_s17 }
  0x2f   : > { %p1457_p11 = pnand %p1455_p10, %p1415_p7  ;;  %p1464_p1 = por %p1463_p0, %p1462_p13 }
  0x31   : > { %p1458_p12 = pneg %p1457_p11 }
  0x33   : > { %p1465_p4 = pnand %p1464_p1, %p1458_p12 }
  0x35   : > { %1468 = shalt.err (!%p1465_p4)
}
  0x36   : > { %s1489_s20 = smov 256   ;;  %s1490_s23 = smov 16  }
  0x37   : > { %1386 = dma.hbm_to_vmem [thread:$0]  (!%p1543_p5), %s2097_s2, 4096, %s1547_s21, [#allocation5], %s1489_s20, %s1489_s20, %s1490_s23  }
  0x38   : > { %p2104_p6 = scmp.ne.s32.totalorder %s2102_s19, 0 }
  0x39   : > { %p2105_p7 = scmp.eq.s32.totalorder (!%p2104_p6), %s1530_s18, 0 }
  0x3a   : > { %191 = sbr.rel (%p2104_p6) target bundleno = 1061 (0x425), region = 32 }
  0x41   : > { %1474 = dma.done.wait (%p2105_p7), [#allocation3], 6144   ;;  %p2106_p2 = pmov %p2105_p7 }
  0x43   : > { %1476 = vsyncadd (%p2106_p2), [#allocation3], 4294961152  ;;  %p2107_p3 = pmov %p2106_p2 }
  0x44   : > { %p2108_p8 = pmov %p2106_p2 }
  0x45   : > { %1478 = dma.done.wait (%p2107_p3), [#allocation5], 4096  }
  0x46   : > { %1480 = vsyncadd (%p2108_p8), [#allocation5], 4294963200  ;;  %v1491_v0 = vmov 0.0   ;;  %v244_v1 = vld [vmem:[#allocation2 + $0x8] sm:$0xff]  ;;  %v247_v2 = vld [vmem:[#allocation2 + $0x20] sm:$0xff]  ;;  %p226_p5 = scmp.lt.s32.totalorder %s1530_s18, 1 }
  0x47   : > { %355 = vmatprep.mubr.f32.mxu1 %v1491_v0  ;;  %1076 = vmatprep.mubr.f32.mxu0 %v1491_v0  ;;  %v243_v3 = vld [vmem:[#allocation2] sm:$0xff]  ;;  %v1276_v4 = vpack.c.bf16 %v247_v2, %v244_v1  ;;  %v246_v5 = vld [vmem:[#allocation2 + $0x18] sm:$0xff]  ;;  %v253_v7 = vld [vmem:[#allocation2 + $0x50] sm:$0xff]  ;;  %s1492_s27 = smov 32   ;;  %s1493_s28 = smov 16   ;;  %vm829_vm0 = vcmask 130048  }
  0x48   : > { %v250_v6 = vld [vmem:[#allocation2 + $0x38] sm:$0xff]  ;;  %v1278_v8 = vpack.c.bf16 %v246_v5, %v243_v3  ;;  %v249_v10 = vld [vmem:[#allocation2 + $0x30] sm:$0xff]  ;;  %v252_v11 = vld [vmem:[#allocation2 + $0x48] sm:$0xff]  ;;  %s2110_s18 = smov (!%p226_p5, %s1530_s18), 1  ;;  %s1494_s29 = smov 48   ;;  %vm846_vm1 = vcmask 261120  }
  0x49   : > { %v1280_v9 = vpack.c.bf16 %v253_v7, %v250_v6  ;;  %v256_v12 = vld [vmem:[#allocation2 + $0x68] sm:$0xff]  ;;  %1277 = vmatprep.subr.bf16.mxu1 %v1276_v4  ;;  %v259_v13 = vld [vmem:[#allocation2 + $0x80] sm:$0xff]  ;;  %v1282_v14 = vpack.c.bf16 %v252_v11, %v249_v10  ;;  %v258_v17 = vld [vmem:[#allocation2 + $0x78] sm:$0xff]  ;;  %s1220_s19 = sshll.u32 %s2110_s18, 4  ;;  %s1495_s30 = smov 64   ;;  %vm863_vm2 = vcmask 392192  }
  0x4a   : > { %1279 = vmatpush1.bf16.msra.mxu1 %v1278_v8  ;;  %v1284_v15 = vpack.c.bf16 %v259_v13, %v256_v12  ;;  %v255_v16 = vld [vmem:[#allocation2 + $0x60] sm:$0xff]  ;;  %v262_v18 = vld [vmem:[#allocation2 + $0x98] sm:$0xff]  ;;  %v265_v19 = vld [vmem:[#allocation2 + $0xb0] sm:$0xff]  ;;  %s230_s26 = scalar_lea.vmem %s2095_s0, %s1220_s19  ;;  %s1496_s5 = smov 96   ;;  %vm880_vm3 = vcmask 523264   ;;  %vm897_vm4 = vcmask 654336  }
  0x4b   : > { %1281 = vmatprep.subr.bf16.mxu1 %v1280_v9  ;;  %v1286_v20 = vpack.c.bf16 %v258_v17, %v255_v16  ;;  %v1288_v21 = vpack.c.bf16 %v265_v19, %v262_v18  ;;  %v261_v22 = vld [vmem:[#allocation2 + $0x90] sm:$0xff]  ;;  %v264_v23 = vld [vmem:[#allocation2 + $0xa8] sm:$0xff]  ;;  %v271_v25 = vld [vmem:[#allocation2 + $0xe0] sm:$0xff]  ;;  %s1497_s6 = smov 80   ;;  %s1498_s7 = smov 112   ;;  %vm914_vm5 = vcmask 785408  }
  0x4c   : > { %v268_v24 = vld [vmem:[#allocation2 + $0xc8] sm:$0xff]  ;;  %v1290_v26 = vpack.c.bf16 %v264_v23, %v261_v22  ;;  %v267_v28 = vld [vmem:[#allocation2 + $0xc0] sm:$0xff]  ;;  %v270_v29 = vld [vmem:[#allocation2 + $0xd8] sm:$0xff]  ;;  %vm931_vm6 = vcmask 916480   ;;  %s240_s10 = scalar_lea.vmem %s2099_s4, %s1220_s19  ;;  %s1221_s11 = sshll.u32 %s2110_s18, 5 }
  0x4d   : > { %v1292_v27 = vpack.c.bf16 %v271_v25, %v268_v24  ;;  %v274_v30 = vld [vmem:[#allocation2 + $0xf8] sm:$0xff]  ;;  %v277_v31 = vld [vmem:[#allocation2 + $0x110] sm:$0xff]  ;;  %v1294_v32 = vpack.c.bf16 %v270_v29, %v267_v28  ;;  %v276_v35 = vld [vmem:[#allocation2 + $0x108] sm:$0xff]  ;;  %s235_s14 = scalar_lea.vmem %s2098_s3, %s1221_s11 }
  0x4e   : > { %1283 = vmatpush1.bf16.msra.mxu1 %v1282_v14  ;;  %v1296_v33 = vpack.c.bf16 %v277_v31, %v274_v30  ;;  %v273_v34 = vld [vmem:[#allocation2 + $0xf0] sm:$0xff]  ;;  %v280_v36 = vld [vmem:[#allocation2 + $0x128] sm:$0xff]  ;;  %v283_v37 = vld [vmem:[#allocation2 + $0x140] sm:$0xff] }
  0x4f   : > { %1285 = vmatprep.subr.bf16.mxu1 %v1284_v15  ;;  %v1298_v38 = vpack.c.bf16 %v276_v35, %v273_v34  ;;  %v1300_v39 = vpack.c.bf16 %v283_v37, %v280_v36  ;;  %v279_v40 = vld [vmem:[#allocation2 + $0x120] sm:$0xff]  ;;  %v282_v41 = vld [vmem:[#allocation2 + $0x138] sm:$0xff]  ;;  %v289_v43 = vld [vmem:[#allocation2 + $0x170] sm:$0xff] }
  0x50   : > { %v286_v42 = vld [vmem:[#allocation2 + $0x158] sm:$0xff]  ;;  %v1302_v44 = vpack.c.bf16 %v282_v41, %v279_v40  ;;  %v285_v46 = vld [vmem:[#allocation2 + $0x150] sm:$0xff]  ;;  %v288_v47 = vld [vmem:[#allocation2 + $0x168] sm:$0xff] }
  0x51   : > { %v1304_v45 = vpack.c.bf16 %v289_v43, %v286_v42  ;;  %v1306_v48 = vpack.c.bf16 %v288_v47, %v285_v46  ;;  %v241_v49 = vld [vmem:[%s230_s26] sm:$0xff]  ;;  %v1619_v50 = vld [vmem:[%s230_s26 + $0x8] sm:$0xff]  ;;  %v951_v41 = vld [vmem:[#allocation4 + $0x18] sm:$0xff] }
  0x52   : > { %1287 = vmatpush1.bf16.msra.mxu1 %v1286_v20  ;;  %v948_v34 = vld [vmem:[#allocation4] sm:$0xff]  ;;  %v949_v40 = vld [vmem:[#allocation4 + $0x8] sm:$0xff] }
  0x53   : > { %1289 = vmatprep.subr.bf16.mxu1 %v1288_v21 }
  0x56   : > { %1291 = vmatpush1.bf16.msra.mxu1 %v1290_v26 }
  0x57   : > { %1293 = vmatprep.subr.bf16.mxu1 %v1292_v27 }
  0x5a   : > { %1295 = vmatpush1.bf16.msra.mxu1 %v1294_v32 }
  0x5b   : > { %1297 = vmatprep.subr.bf16.mxu1 %v1296_v33 }
  0x5e   : > { %1299 = vmatpush1.bf16.msra.mxu1 %v1298_v38 }
  0x5f   : > { %1301 = vmatprep.subr.bf16.mxu1 %v1300_v39  ;;  %v950_v39 = vld [vmem:[#allocation4 + $0x10] sm:$0xff] }
  0x62   : > { %1303 = vmatpush1.bf16.msra.mxu1 %v1302_v44 }
  0x63   : > { %1305 = vmatprep.subr.bf16.mxu1 %v1304_v45 }
  0x66   : > { %1307 = vmatpush1.bf16.msra.mxu1 %v1306_v48 }
  0x69   : > { %356 = vmatmul.mubr.f32.vlgmr.msra.gmra.mrb[0].mxu1 %v241_v49 }
  0x6a   : > { %361 = vmatprep.mubr.f32.mxu1 %v1491_v0 }
  0x6d   : > { %362 = vmatmul.mubr.f32.gmra.mrb[2].mxu1 %v1619_v50 }
  0x6e   : > { %1273 = vmatprep.mubr.f32.mxu1 %v241_v49 }
 0x13c   : > { %v1622_v51 = vpop.f32.mrb[0].mxu1 }
 0x13d   : > { %v359_v52 = vpop.f32.mrb[1].mxu1 }
 0x13e   : > { %445 = vxpose.xlu0.b32.start [1/2] (short) %v359_v52, 128 }
 0x140   : > { %v1624_v53 = vpop.f32.mrb[2].mxu1 }
 0x141   : > { %v365_v54 = vpop.f32.mrb[3].mxu1 }
 0x142   : > { %446 = vxpose.xlu0.b32.end [2/2] (short) %v365_v54, 128 }
 0x1be   : > { %v1626_v55 = vpop.trf.xlu0 }
 0x1bf   : > { %541 = vrot.lane.b32.xlu0 %v1626_v55, %s1492_s27  ;;  %493 = vrot.lane.b32.xlu1 %v1626_v55, %s1493_s28 }
 0x1c2   : > { %v1632_v56 = vpop.trf.xlu0 }
 0x1c3   : > { %589 = vrot.lane.b32.xlu1 %v1626_v55, %s1494_s29 }
 0x1c6   : > { %v1636_v57 = vpop.trf.xlu0 }
 0x1c7   : > { %637 = vrot.lane.b32.xlu1 %v1626_v55, %s1495_s30  ;;  %737 = vrot.lane.b32.xlu0 %v1636_v57, %s1496_s5 }
 0x1ca   : > { %v1642_v58 = vpop.trf.xlu0 }
 0x1cb   : > { %685 = vrot.lane.b32.xlu1 %v1626_v55, %s1497_s6  ;;  %785 = vrot.lane.b32.xlu0 %v1636_v57, %s1498_s7 }
 0x1ce   : > { %v1648_v59 = vpop.trf.xlu0 }
 0x1cf   : > { %733 = vrot.lane.b32.xlu1 %v1626_v55, %s1496_s5  ;;  %597 = vrot.lane.b32.xlu0 %v1648_v59, %s1494_s29 }
 0x1d2   : > { %v1662_v60 = vpop.trf.xlu0 }
 0x1d3   : > { %781 = vrot.lane.b32.xlu1 %v1626_v55, %s1498_s7  ;;  %645 = vrot.lane.b32.xlu0 %v1648_v59, %s1495_s30 }
 0x1d6   : > { %v1672_v61 = vpop.trf.xlu0 }
 0x1d7   : > { %495 = vrot.lane.b32.xlu1 %v1632_v56, %s1493_s28  ;;  %693 = vrot.lane.b32.xlu0 %v1648_v59, %s1497_s6 }
 0x1da   : > { %v1694_v62 = vpop.trf.xlu0 }
 0x1db   : > { %543 = vrot.lane.b32.xlu1 %v1632_v56, %s1492_s27  ;;  %741 = vrot.lane.b32.xlu0 %v1648_v59, %s1496_s5 }
 0x1de   : > { %v1704_v63 = vpop.trf.xlu0 }
 0x1df   : > { %591 = vrot.lane.b32.xlu1 %v1632_v56, %s1494_s29  ;;  %789 = vrot.lane.b32.xlu0 %v1648_v59, %s1498_s7 }
 0x1e2   : > { %v1726_v1 = vpop.trf.xlu0 }
 0x1e3   : > { %639 = vrot.lane.b32.xlu1 %v1632_v56, %s1495_s30  ;;  %505 = vrot.lane.b32.xlu0 %v1672_v61, %s1493_s28 }
 0x1e6   : > { %v1736_v2 = vpop.trf.xlu0 }
 0x1e7   : > { %687 = vrot.lane.b32.xlu1 %v1632_v56, %s1497_s6  ;;  %553 = vrot.lane.b32.xlu0 %v1672_v61, %s1492_s27 }
 0x1ea   : > { %v1750_v3 = vpop.trf.xlu0 }
 0x1eb   : > { %735 = vrot.lane.b32.xlu1 %v1632_v56, %s1496_s5  ;;  %601 = vrot.lane.b32.xlu0 %v1672_v61, %s1494_s29 }
 0x1ee   : > { %v1756_v4 = vpop.trf.xlu0 }
 0x1ef   : > { %783 = vrot.lane.b32.xlu1 %v1632_v56, %s1498_s7  ;;  %649 = vrot.lane.b32.xlu0 %v1672_v61, %s1495_s30 }
 0x1f2   : > { %v1766_v5 = vpop.trf.xlu0 }
 0x1f3   : > { %497 = vrot.lane.b32.xlu1 %v1636_v57, %s1493_s28  ;;  %697 = vrot.lane.b32.xlu0 %v1672_v61, %s1497_s6 }
 0x1f6   : > { %v1772_v8 = vpop.trf.xlu0 }
 0x1f7   : > { %545 = vrot.lane.b32.xlu1 %v1636_v57, %s1492_s27  ;;  %745 = vrot.lane.b32.xlu0 %v1672_v61, %s1496_s5 }
 0x1fa   : > { %v1782_v10 = vpop.trf.xlu0 }
 0x1fb   : > { %593 = vrot.lane.b32.xlu1 %v1636_v57, %s1494_s29  ;;  %793 = vrot.lane.b32.xlu0 %v1672_v61, %s1498_s7 }
 0x1ff   : > { %641 = vrot.lane.b32.xlu1 %v1636_v57, %s1495_s30  ;;  %509 = vrot.lane.b32.xlu0 %v1704_v63, %s1493_s28 }
 0x203   : > { %689 = vrot.lane.b32.xlu1 %v1636_v57, %s1497_s6  ;;  %557 = vrot.lane.b32.xlu0 %v1704_v63, %s1492_s27 }
 0x207   : > { %499 = vrot.lane.b32.xlu1 %v1642_v58, %s1493_s28  ;;  %605 = vrot.lane.b32.xlu0 %v1704_v63, %s1494_s29 }
 0x20b   : > { %547 = vrot.lane.b32.xlu1 %v1642_v58, %s1492_s27  ;;  %653 = vrot.lane.b32.xlu0 %v1704_v63, %s1495_s30 }
 0x20f   : > { %595 = vrot.lane.b32.xlu1 %v1642_v58, %s1494_s29  ;;  %701 = vrot.lane.b32.xlu0 %v1704_v63, %s1497_s6 }
 0x213   : > { %643 = vrot.lane.b32.xlu1 %v1642_v58, %s1495_s30  ;;  %749 = vrot.lane.b32.xlu0 %v1704_v63, %s1496_s5 }
 0x217   : > { %691 = vrot.lane.b32.xlu1 %v1642_v58, %s1497_s6  ;;  %797 = vrot.lane.b32.xlu0 %v1704_v63, %s1498_s7 }
 0x21b   : > { %739 = vrot.lane.b32.xlu1 %v1642_v58, %s1496_s5  ;;  %513 = vrot.lane.b32.xlu0 %v1736_v2, %s1493_s28 }
 0x21f   : > { %787 = vrot.lane.b32.xlu1 %v1642_v58, %s1498_s7  ;;  %561 = vrot.lane.b32.xlu0 %v1736_v2, %s1492_s27 }
 0x223   : > { %501 = vrot.lane.b32.xlu1 %v1648_v59, %s1493_s28  ;;  %609 = vrot.lane.b32.xlu0 %v1736_v2, %s1494_s29 }
 0x227   : > { %549 = vrot.lane.b32.xlu1 %v1648_v59, %s1492_s27  ;;  %657 = vrot.lane.b32.xlu0 %v1736_v2, %s1495_s30 }
 0x22b   : > { %503 = vrot.lane.b32.xlu1 %v1662_v60, %s1493_s28  ;;  %705 = vrot.lane.b32.xlu0 %v1736_v2, %s1497_s6 }
 0x22f   : > { %551 = vrot.lane.b32.xlu1 %v1662_v60, %s1492_s27  ;;  %753 = vrot.lane.b32.xlu0 %v1736_v2, %s1496_s5 }
 0x231   : > { %v494_v6 = vpop.permute.xlu1 %493  ;;  %v542_v13 = vpop.permute.xlu0 %541 }
 0x232   : > { %v830_v22 = vsel %vm829_vm0, %v1626_v55, %v494_v6 }
 0x233   : > { %599 = vrot.lane.b32.xlu1 %v1662_v60, %s1494_s29  ;;  %801 = vrot.lane.b32.xlu0 %v1736_v2, %s1498_s7  ;;  %v847_v25 = vsel %vm846_vm1, %v830_v22, %v542_v13 }
 0x235   : > { %v590_v7 = vpop.permute.xlu1 %589 }
 0x236   : > { %v864_v26 = vsel %vm863_vm2, %v847_v25, %v590_v7 }
 0x237   : > { %647 = vrot.lane.b32.xlu1 %v1662_v60, %s1495_s30  ;;  %517 = vrot.lane.b32.xlu0 %v1756_v4, %s1493_s28 }
 0x239   : > { %v638_v9 = vpop.permute.xlu1 %637  ;;  %v1792_v15 = vpop.permute.xlu0 %737 }
 0x23a   : > { %v881_v27 = vsel %vm880_vm3, %v864_v26, %v638_v9 }
 0x23b   : > { %695 = vrot.lane.b32.xlu1 %v1662_v60, %s1497_s6  ;;  %565 = vrot.lane.b32.xlu0 %v1756_v4, %s1492_s27 }
 0x23d   : > { %v686_v11 = vpop.permute.xlu1 %685  ;;  %v1802_v17 = vpop.permute.xlu0 %785 }
 0x23e   : > { %v898_v29 = vsel %vm897_vm4, %v881_v27, %v686_v11 }
 0x23f   : > { %743 = vrot.lane.b32.xlu1 %v1662_v60, %s1496_s5  ;;  %613 = vrot.lane.b32.xlu0 %v1756_v4, %s1494_s29 }
 0x241   : > { %v734_v12 = vpop.permute.xlu1 %733  ;;  %v1808_v20 = vpop.permute.xlu0 %597 }
 0x242   : > { %v915_v32 = vsel %vm914_vm5, %v898_v29, %v734_v12 }
 0x243   : > { %791 = vrot.lane.b32.xlu1 %v1662_v60, %s1498_s7  ;;  %661 = vrot.lane.b32.xlu0 %v1756_v4, %s1495_s30 }
 0x245   : > { %v782_v14 = vpop.permute.xlu1 %781  ;;  %v1820_v23 = vpop.permute.xlu0 %645 }
 0x246   : > { %v932_v35 = vsel %vm931_vm6, %v915_v32, %v782_v14 }
 0x247   : > { %507 = vrot.lane.b32.xlu1 %v1694_v62, %s1493_s28  ;;  %709 = vrot.lane.b32.xlu0 %v1756_v4, %s1497_s6  ;;  %v980_v44 = vmul.f32 %v948_v34, %v932_v35  ;;  %v981_v47 = vmul.f32 %v949_v40, %v932_v35  ;;  %v954_v40 = vld [vmem:[#allocation4 + $0x30] sm:$0xff] }
 0x249   : > { %v496_v16 = vpop.permute.xlu1 %495  ;;  %v1836_v36 = vpop.permute.xlu0 %693 }
 0x24a   : > { %v831_v28 = vsel %vm829_vm0, %v1632_v56, %v496_v16 }
 0x24b   : > { %555 = vrot.lane.b32.xlu1 %v1694_v62, %s1492_s27  ;;  %757 = vrot.lane.b32.xlu0 %v1756_v4, %s1496_s5 }
 0x24d   : > { %v544_v18 = vpop.permute.xlu1 %543  ;;  %v1850_v49 = vpop.permute.xlu0 %741 }
 0x24e   : > { %v848_v30 = vsel %vm846_vm1, %v831_v28, %v544_v18 }
 0x24f   : > { %603 = vrot.lane.b32.xlu1 %v1694_v62, %s1494_s29  ;;  %805 = vrot.lane.b32.xlu0 %v1756_v4, %s1498_s7 }
 0x251   : > { %v592_v19 = vpop.permute.xlu1 %591  ;;  %v1856_v6 = vpop.permute.xlu0 %789 }
 0x252   : > { %v865_v33 = vsel %vm863_vm2, %v848_v30, %v592_v19 }
 0x253   : > { %651 = vrot.lane.b32.xlu1 %v1694_v62, %s1495_s30  ;;  %521 = vrot.lane.b32.xlu0 %v1772_v8, %s1493_s28 }
 0x255   : > { %v640_v21 = vpop.permute.xlu1 %639  ;;  %v1864_v9 = vpop.permute.xlu0 %505 }
 0x256   : > { %v882_v37 = vsel %vm880_vm3, %v865_v33, %v640_v21 }
 0x257   : > { %699 = vrot.lane.b32.xlu1 %v1694_v62, %s1497_s6  ;;  %569 = vrot.lane.b32.xlu0 %v1772_v8, %s1492_s27 }
 0x259   : > { %v688_v24 = vpop.permute.xlu1 %687  ;;  %v1868_v13 = vpop.permute.xlu0 %553 }
 0x25a   : > { %v899_v38 = vsel %vm897_vm4, %v882_v37, %v688_v24 }
 0x25b   : > { %747 = vrot.lane.b32.xlu1 %v1694_v62, %s1496_s5  ;;  %617 = vrot.lane.b32.xlu0 %v1772_v8, %s1494_s29 }
 0x25d   : > { %v736_v31 = vpop.permute.xlu1 %735  ;;  %v1874_v16 = vpop.permute.xlu0 %601 }
 0x25e   : > { %v916_v42 = vsel %vm914_vm5, %v899_v38, %v736_v31  ;;  %v953_v38 = vld [vmem:[#allocation4 + $0x28] sm:$0xff] }
 0x25f   : > { %795 = vrot.lane.b32.xlu1 %v1694_v62, %s1498_s7  ;;  %665 = vrot.lane.b32.xlu0 %v1772_v8, %s1495_s30 }
 0x261   : > { %v784_v43 = vpop.permute.xlu1 %783  ;;  %v1878_v21 = vpop.permute.xlu0 %649 }
 0x262   : > { %v933_v45 = vsel %vm931_vm6, %v916_v42, %v784_v43 }
 0x263   : > { %v982_v46 = vmul.f32 %v950_v39, %v933_v45  ;;  %511 = vrot.lane.b32.xlu1 %v1726_v1, %s1493_s28  ;;  %713 = vrot.lane.b32.xlu0 %v1772_v8, %s1497_s6  ;;  %v983_v48 = vmul.f32 %v951_v41, %v933_v45  ;;  %v952_v41 = vld [vmem:[#allocation4 + $0x20] sm:$0xff] }
 0x265   : > { %v498_v52 = vpop.permute.xlu1 %497  ;;  %v1340_v54 = vpack.c.bf16 %v983_v48, %v981_v47  ;;  %v1342_v55 = vpack.c.bf16 %v982_v46, %v980_v44  ;;  %v1888_v27 = vpop.permute.xlu0 %697 }
 0x266   : > { %v832_v24 = vsel %vm829_vm0, %v1636_v57, %v498_v52 }
 0x267   : > { %559 = vrot.lane.b32.xlu1 %v1726_v1, %s1492_s27  ;;  %761 = vrot.lane.b32.xlu0 %v1772_v8, %s1496_s5 }
 0x268   : > { %1341 = vmatprep.subr.bf16.mxu0 %v1340_v54 }
 0x269   : > { %1343 = vmatpush1.bf16.msra.mxu0 %v1342_v55  ;;  %v546_v56 = vpop.permute.xlu1 %545  ;;  %v1900_v35 = vpop.permute.xlu0 %745 }
 0x26a   : > { %v849_v25 = vsel %vm846_vm1, %v832_v24, %v546_v56 }
 0x26b   : > { %607 = vrot.lane.b32.xlu1 %v1726_v1, %s1494_s29  ;;  %809 = vrot.lane.b32.xlu0 %v1772_v8, %s1498_s7 }
 0x26d   : > { %v594_v7 = vpop.permute.xlu1 %593  ;;  %v1912_v52 = vpop.permute.xlu0 %793 }
 0x26e   : > { %v866_v26 = vsel %vm863_vm2, %v849_v25, %v594_v7 }
 0x26f   : > { %655 = vrot.lane.b32.xlu1 %v1726_v1, %s1495_s30 }
 0x271   : > { %v642_v11 = vpop.permute.xlu1 %641  ;;  %v1916_v7 = vpop.permute.xlu0 %509 }
 0x272   : > { %v883_v28 = vsel %vm880_vm3, %v866_v26, %v642_v11 }
 0x273   : > { %703 = vrot.lane.b32.xlu1 %v1726_v1, %s1497_s6 }
 0x275   : > { %v690_v12 = vpop.permute.xlu1 %689 }
 0x276   : > { %v900_v30 = vsel %vm897_vm4, %v883_v28, %v690_v12  ;;  %v1922_v12 = vpop.permute.xlu0 %557 }
 0x277   : > { %751 = vrot.lane.b32.xlu1 %v1726_v1, %s1496_s5  ;;  %v917_v31 = vsel %vm914_vm5, %v900_v30, %v1792_v15  ;;  %v955_v15 = vld [vmem:[#allocation4 + $0x38] sm:$0xff] }
 0x278   : > { %v934_v39 = vsel %vm931_vm6, %v917_v31, %v1802_v17 }
 0x279   : > { %v500_v14 = vpop.permute.xlu1 %499  ;;  %v985_v47 = vmul.f32 %v953_v38, %v934_v39  ;;  %v984_v48 = vmul.f32 %v952_v41, %v934_v39  ;;  %v956_v41 = vld [vmem:[#allocation4 + $0x40] sm:$0xff] }
 0x27a   : > { %v833_v57 = vsel %vm829_vm0, %v1642_v58, %v500_v14  ;;  %v1929_v24 = vpop.permute.xlu0 %605 }
 0x27b   : > { %799 = vrot.lane.b32.xlu1 %v1726_v1, %s1498_s7 }
 0x27d   : > { %v548_v18 = vpop.permute.xlu1 %547 }
 0x27e   : > { %v850_v32 = vsel %vm846_vm1, %v833_v57, %v548_v18  ;;  %v1939_v30 = vpop.permute.xlu0 %653 }
 0x27f   : > { %515 = vrot.lane.b32.xlu1 %v1750_v3, %s1493_s28 }
 0x281   : > { %v596_v19 = vpop.permute.xlu1 %595 }
 0x282   : > { %v867_v34 = vsel %vm863_vm2, %v850_v32, %v596_v19 }
 0x283   : > { %563 = vrot.lane.b32.xlu1 %v1750_v3, %s1492_s27 }
 0x285   : > { %v644_v22 = vpop.permute.xlu1 %643 }
 0x286   : > { %v884_v37 = vsel %vm880_vm3, %v867_v34, %v644_v22  ;;  %v254_v34 = vld [vmem:[#allocation2 + $0x58] sm:$0xff] }
 0x287   : > { %611 = vrot.lane.b32.xlu1 %v1750_v3, %s1494_s29 }
 0x289   : > { %v692_v29 = vpop.permute.xlu1 %691 }
 0x28a   : > { %v901_v58 = vsel %vm897_vm4, %v884_v37, %v692_v29  ;;  %v248_v29 = vld [vmem:[#allocation2 + $0x28] sm:$0xff] }
 0x28b   : > { %659 = vrot.lane.b32.xlu1 %v1750_v3, %s1495_s30 }
 0x28d   : > { %v740_v33 = vpop.permute.xlu1 %739 }
 0x28e   : > { %v918_v42 = vsel %vm914_vm5, %v901_v58, %v740_v33  ;;  %v251_v33 = vld [vmem:[#allocation2 + $0x40] sm:$0xff]  ;;  %v1951_v58 = vpop.permute.xlu0 %701 }
 0x28f   : > { %707 = vrot.lane.b32.xlu1 %v1750_v3, %s1497_s6  ;;  %v1312_v39 = vpack.c.bf16 %v254_v34, %v251_v33  ;;  %v281_v34 = vld [vmem:[#allocation2 + $0x130] sm:$0xff] }
 0x291   : > { %v788_v43 = vpop.permute.xlu1 %787 }
 0x292   : > { %v935_v44 = vsel %vm931_vm6, %v918_v42, %v788_v43  ;;  %v959_v43 = vld [vmem:[#allocation4 + $0x58] sm:$0xff] }
 0x293   : > { %v986_v45 = vmul.f32 %v954_v40, %v935_v44  ;;  %v987_v46 = vmul.f32 %v955_v15, %v935_v44  ;;  %755 = vrot.lane.b32.xlu1 %v1750_v3, %s1496_s5  ;;  %v957_v15 = vld [vmem:[#allocation4 + $0x48] sm:$0xff]  ;;  %v257_v44 = vld [vmem:[#allocation2 + $0x70] sm:$0xff] }
 0x295   : > { %v502_v17 = vpop.permute.xlu1 %501  ;;  %v1344_v54 = vpack.c.bf16 %v987_v46, %v985_v47  ;;  %v1346_v55 = vpack.c.bf16 %v986_v45, %v984_v48  ;;  %v260_v45 = vld [vmem:[#allocation2 + $0x88] sm:$0xff] }
 0x296   : > { %v834_v18 = vsel %vm829_vm0, %v1648_v59, %v502_v17  ;;  %v245_v59 = vld [vmem:[#allocation2 + $0x10] sm:$0xff]  ;;  %v1316_v48 = vpack.c.bf16 %v260_v45, %v257_v44 }
 0x297   : > { %803 = vrot.lane.b32.xlu1 %v1750_v3, %s1498_s7  ;;  %1345 = vmatprep.subr.bf16.mxu0 %v1344_v54  ;;  %v1308_v32 = vpack.c.bf16 %v248_v29, %v245_v59  ;;  %v272_v59 = vld [vmem:[#allocation2 + $0xe8] sm:$0xff] }
 0x298   : > { %1347 = vmatpush1.bf16.msra.mxu0 %v1346_v55 }
 0x299   : > { %v550_v56 = vpop.permute.xlu1 %549  ;;  %1309 = vmatprep.subr.bf16.mxu1 %v1308_v32 }
 0x29a   : > { %v851_v19 = vsel %vm846_vm1, %v834_v18, %v550_v56  ;;  %1311 = vmatpush3.bf16.msra.mxu1 %v1308_v32  ;;  %v1963_v18 = vpop.permute.xlu0 %749  ;;  %v275_v32 = vld [vmem:[#allocation2 + $0x100] sm:$0xff] }
 0x29b   : > { %519 = vrot.lane.b32.xlu1 %v1766_v5, %s1493_s28  ;;  %v868_v25 = vsel %vm863_vm2, %v851_v19, %v1808_v20  ;;  %1313 = vmatprep.subr.bf16.mxu1 %v1312_v39 }
 0x29c   : > { %v885_v28 = vsel %vm880_vm3, %v868_v25, %v1820_v23 }
 0x29d   : > { %v504_v11 = vpop.permute.xlu1 %503  ;;  %v902_v57 = vsel %vm897_vm4, %v885_v28, %v1836_v36  ;;  %v269_v28 = vld [vmem:[#allocation2 + $0xd0] sm:$0xff] }
 0x29e   : > { %v835_v20 = vsel %vm829_vm0, %v1662_v60, %v504_v11  ;;  %v919_v23 = vsel %vm914_vm5, %v902_v57, %v1850_v49  ;;  %v958_v60 = vld [vmem:[#allocation4 + $0x50] sm:$0xff]  ;;  %1315 = vmatpush3.bf16.msra.mxu1 %v1312_v39  ;;  %v263_v11 = vld [vmem:[#allocation2 + $0xa0] sm:$0xff]  ;;  %v1324_v57 = vpack.c.bf16 %v272_v59, %v269_v28 }
 0x29f   : > { %567 = vrot.lane.b32.xlu1 %v1766_v5, %s1492_s27  ;;  %v936_v49 = vsel %vm931_vm6, %v919_v23, %v1856_v6  ;;  %1317 = vmatprep.subr.bf16.mxu1 %v1316_v48 }
 0x2a0   : > { %v989_v54 = vmul.f32 %v957_v15, %v936_v49  ;;  %v988_v6 = vmul.f32 %v956_v41, %v936_v49  ;;  %v836_v41 = vsel %vm829_vm0, %v1672_v61, %v1864_v9 }
 0x2a1   : > { %v552_v14 = vpop.permute.xlu1 %551 }
 0x2a2   : > { %v852_v37 = vsel %vm846_vm1, %v835_v20, %v552_v14  ;;  %1319 = vmatpush3.bf16.msra.mxu1 %v1316_v48  ;;  %v266_v14 = vld [vmem:[#allocation2 + $0xb8] sm:$0xff] }
 0x2a3   : > { %615 = vrot.lane.b32.xlu1 %v1766_v5, %s1494_s29  ;;  %v278_v20 = vld [vmem:[#allocation2 + $0x118] sm:$0xff] }
 0x2a4   : > { %v1328_v33 = vpack.c.bf16 %v278_v20, %v275_v32 }
 0x2a5   : > { %v600_v22 = vpop.permute.xlu1 %599 }
 0x2a6   : > { %v869_v36 = vsel %vm863_vm2, %v852_v37, %v600_v22  ;;  %v284_v37 = vld [vmem:[#allocation2 + $0x148] sm:$0xff] }
 0x2a7   : > { %663 = vrot.lane.b32.xlu1 %v1766_v5, %s1495_s30 }
 0x2a9   : > { %v648_v26 = vpop.permute.xlu1 %647 }
 0x2aa   : > { %v886_v40 = vsel %vm880_vm3, %v869_v36, %v648_v26  ;;  %v1320_v26 = vpack.c.bf16 %v266_v14, %v263_v11 }
 0x2ab   : > { %711 = vrot.lane.b32.xlu1 %v1766_v5, %s1497_s6 }
 0x2ac   : > { %1321 = vmatprep.subr.bf16.mxu1 %v1320_v26 }
 0x2ad   : > { %v696_v31 = vpop.permute.xlu1 %695  ;;  %1323 = vmatpush3.bf16.msra.mxu1 %v1320_v26 }
 0x2ae   : > { %v903_v42 = vsel %vm897_vm4, %v886_v40, %v696_v31  ;;  %v1967_v31 = vpop.permute.xlu0 %797  ;;  %1325 = vmatprep.subr.bf16.mxu1 %v1324_v57  ;;  %v287_v40 = vld [vmem:[#allocation2 + $0x160] sm:$0xff] }
 0x2af   : > { %759 = vrot.lane.b32.xlu1 %v1766_v5, %s1496_s5 }
 0x2b1   : > { %v744_v38 = vpop.permute.xlu1 %743  ;;  %1327 = vmatpush3.bf16.msra.mxu1 %v1324_v57 }
 0x2b2   : > { %v920_v46 = vsel %vm914_vm5, %v903_v42, %v744_v38  ;;  %1329 = vmatprep.subr.bf16.mxu1 %v1328_v33  ;;  %v1332_v38 = vpack.c.bf16 %v284_v37, %v281_v34  ;;  %v1973_v39 = vpop.permute.xlu0 %513  ;;  %v853_v42 = vsel %vm846_vm1, %v836_v41, %v1868_v13  ;;  %v965_v41 = vld [vmem:[#allocation4 + $0x88] sm:$0xff] }
 0x2b3   : > { %807 = vrot.lane.b32.xlu1 %v1766_v5, %s1498_s7  ;;  %v870_v44 = vsel %vm863_vm2, %v853_v42, %v1874_v16  ;;  %v966_v42 = vld [vmem:[#allocation4 + $0x90] sm:$0xff] }
 0x2b5   : > { %v792_v47 = vpop.permute.xlu1 %791  ;;  %1331 = vmatpush3.bf16.msra.mxu1 %v1328_v33  ;;  %v838_v33 = vsel %vm829_vm0, %v1704_v63, %v1916_v7 }
 0x2b6   : > { %v937_v17 = vsel %vm931_vm6, %v920_v46, %v792_v47  ;;  %1333 = vmatprep.subr.bf16.mxu1 %v1332_v38  ;;  %v887_v46 = vsel %vm880_vm3, %v870_v44, %v1878_v21  ;;  %v855_v34 = vsel %vm846_vm1, %v838_v33, %v1922_v12  ;;  %v964_v12 = vld [vmem:[#allocation4 + $0x80] sm:$0xff]  ;;  %v967_v44 = vld [vmem:[#allocation4 + $0x98] sm:$0xff] }
 0x2b7   : > { %v990_v55 = vmul.f32 %v958_v60, %v937_v17  ;;  %v991_v56 = vmul.f32 %v959_v43, %v937_v17  ;;  %523 = vrot.lane.b32.xlu1 %v1782_v10, %s1493_s28  ;;  %v290_v60 = vld [vmem:[#allocation2 + $0x178] sm:$0xff]  ;;  %v1982_v43 = vpop.permute.xlu0 %561  ;;  %v904_v13 = vsel %vm897_vm4, %v887_v46, %v1888_v27  ;;  %v960_v17 = vld [vmem:[#allocation4 + $0x60] sm:$0xff]  ;;  %v872_v37 = vsel %vm863_vm2, %v855_v34, %v1929_v24 }
 0x2b8   : > { %v1336_v15 = vpack.c.bf16 %v290_v60, %v287_v40  ;;  %v921_v48 = vsel %vm914_vm5, %v904_v13, %v1900_v35 }
 0x2b9   : > { %v508_v19 = vpop.permute.xlu1 %507  ;;  %v1348_v22 = vpack.c.bf16 %v991_v56, %v989_v54  ;;  %v1350_v25 = vpack.c.bf16 %v990_v55, %v988_v6  ;;  %1335 = vmatpush3.bf16.msra.mxu1 %v1332_v38  ;;  %v938_v21 = vsel %vm931_vm6, %v921_v48, %v1912_v52  ;;  %v962_v55 = vld [vmem:[#allocation4 + $0x70] sm:$0xff]  ;;  %v963_v56 = vld [vmem:[#allocation4 + $0x78] sm:$0xff] }
 0x2ba   : > { %1337 = vmatprep.subr.bf16.mxu1 %v1336_v15  ;;  %v837_v45 = vsel %vm829_vm0, %v1694_v62, %v508_v19  ;;  %v961_v62 = vld [vmem:[#allocation4 + $0x68] sm:$0xff]  ;;  %v992_v14 = vmul.f32 %v960_v17, %v938_v21 }
 0x2bb   : > { %571 = vrot.lane.b32.xlu1 %v1782_v10, %s1492_s27  ;;  %1349 = vmatprep.subr.bf16.mxu0 %v1348_v22  ;;  %v610_v27 = vpop.permute.xlu0 %609  ;;  %v993_v19 = vmul.f32 %v961_v62, %v938_v21 }
 0x2bc   : > { %1351 = vmatpush1.bf16.msra.mxu0 %v1350_v25 }
 0x2bd   : > { %v556_v29 = vpop.permute.xlu1 %555  ;;  %1339 = vmatpush3.bf16.msra.mxu1 %v1336_v15 }
 0x2be   : > { %v854_v61 = vsel %vm846_vm1, %v837_v45, %v556_v29 }
 0x2bf   : > { %619 = vrot.lane.b32.xlu1 %v1782_v10, %s1494_s29  ;;  %v658_v52 = vpop.permute.xlu0 %657 }
 0x2c0   : > { %1274 = vmatmul.mubr.f32.vlgmr.msra.gmra.mrb[4].mxu1 %v1619_v50 }
 0x2c1   : > { %v604_v23 = vpop.permute.xlu1 %603 }
 0x2c2   : > { %v871_v47 = vsel %vm863_vm2, %v854_v61, %v604_v23 }
 0x2c3   : > { %667 = vrot.lane.b32.xlu1 %v1782_v10, %s1495_s30  ;;  %v706_v57 = vpop.permute.xlu0 %705 }
 0x2c5   : > { %v652_v36 = vpop.permute.xlu1 %651 }
 0x2c6   : > { %v888_v16 = vsel %vm880_vm3, %v871_v47, %v652_v36  ;;  %v889_v36 = vsel %vm880_vm3, %v872_v37, %v1939_v30 }
 0x2c7   : > { %715 = vrot.lane.b32.xlu1 %v1782_v10, %s1497_s6  ;;  %v754_v20 = vpop.permute.xlu0 %753  ;;  %v906_v15 = vsel %vm897_vm4, %v889_v36, %v1951_v58 }
 0x2c8   : > { %v923_v7 = vsel %vm914_vm5, %v906_v15, %v1963_v18 }
 0x2c9   : > { %v700_v49 = vpop.permute.xlu1 %699 }
 0x2ca   : > { %v905_v54 = vsel %vm897_vm4, %v888_v16, %v700_v49 }
 0x2cb   : > { %763 = vrot.lane.b32.xlu1 %v1782_v10, %s1496_s5  ;;  %v802_v40 = vpop.permute.xlu0 %801 }
 0x2cd   : > { %v748_v9 = vpop.permute.xlu1 %747 }
 0x2ce   : > { %v922_v6 = vsel %vm914_vm5, %v905_v54, %v748_v9 }
 0x2cf   : > { %811 = vrot.lane.b32.xlu1 %v1782_v10, %s1498_s7  ;;  %v518_v13 = vpop.permute.xlu0 %517 }
 0x2d1   : > { %v796_v35 = vpop.permute.xlu1 %795 }
 0x2d2   : > { %v939_v11 = vsel %vm931_vm6, %v922_v6, %v796_v35  ;;  %v840_v35 = vsel %vm829_vm0, %v1736_v2, %v1973_v39  ;;  %v968_v2 = vld [vmem:[#allocation4 + $0xa0] sm:$0xff] }
 0x2d3   : > { %v994_v22 = vmul.f32 %v962_v55, %v939_v11  ;;  %v995_v25 = vmul.f32 %v963_v56, %v939_v11  ;;  %v857_v11 = vsel %vm846_vm1, %v840_v35, %v1982_v43 }
 0x2d5   : > { %v512_v26 = vpop.permute.xlu1 %511  ;;  %v1352_v28 = vpack.c.bf16 %v995_v25, %v993_v19  ;;  %v1354_v59 = vpack.c.bf16 %v994_v22, %v992_v14  ;;  %v874_v14 = vsel %vm863_vm2, %v857_v11, %v610_v27 }
 0x2d6   : > { %v839_v38 = vsel %vm829_vm0, %v1726_v1, %v512_v26  ;;  %v940_v1 = vsel %vm931_vm6, %v923_v7, %v1967_v31  ;;  %v566_v31 = vpop.permute.xlu0 %565  ;;  %v891_v22 = vsel %vm880_vm3, %v874_v14, %v658_v52  ;;  %v971_v52 = vld [vmem:[#allocation4 + $0xb8] sm:$0xff] }
 0x2d7   : > { %1353 = vmatprep.subr.bf16.mxu0 %v1352_v28  ;;  %v996_v61 = vmul.f32 %v964_v12, %v940_v1  ;;  %v997_v9 = vmul.f32 %v965_v41, %v940_v1  ;;  %v908_v28 = vsel %vm897_vm4, %v891_v22, %v706_v57  ;;  %v842_v1 = vsel %vm829_vm0, %v1756_v4, %v518_v13  ;;  %v972_v4 = vld [vmem:[#allocation4 + $0xc0] sm:$0xff] }
 0x2d8   : > { %1355 = vmatpush1.bf16.msra.mxu0 %v1354_v59 }
 0x2d9   : > { %v560_v29 = vpop.permute.xlu1 %559 }
 0x2da   : > { %v856_v60 = vsel %vm846_vm1, %v839_v38, %v560_v29  ;;  %v614_v54 = vpop.permute.xlu0 %613  ;;  %v925_v29 = vsel %vm914_vm5, %v908_v28, %v754_v20 }
 0x2db   : > { %v942_v27 = vsel %vm931_vm6, %v925_v29, %v802_v40 }
 0x2dc   : > { %v1000_v34 = vmul.f32 %v968_v2, %v942_v27 }
 0x2dd   : > { %v608_v32 = vpop.permute.xlu1 %607 }
 0x2de   : > { %v873_v63 = vsel %vm863_vm2, %v856_v60, %v608_v32  ;;  %v662_v56 = vpop.permute.xlu0 %661  ;;  %v969_v32 = vld [vmem:[#allocation4 + $0xa8] sm:$0xff] }
 0x2df   : > { %v1001_v37 = vmul.f32 %v969_v32, %v942_v27 }
 0x2e1   : > { %v656_v50 = vpop.permute.xlu1 %655 }
 0x2e2   : > { %v890_v24 = vsel %vm880_vm3, %v873_v63, %v656_v50  ;;  %v710_v39 = vpop.permute.xlu0 %709  ;;  %v970_v50 = vld [vmem:[#allocation4 + $0xb0] sm:$0xff] }
 0x2e5   : > { %v704_v23 = vpop.permute.xlu1 %703 }
 0x2e6   : > { %v907_v30 = vsel %vm897_vm4, %v890_v24, %v704_v23  ;;  %v758_v36 = vpop.permute.xlu0 %757 }
 0x2e9   : > { %v752_v49 = vpop.permute.xlu1 %751 }
 0x2ea   : > { %v924_v45 = vsel %vm914_vm5, %v907_v30, %v752_v49  ;;  %v806_v63 = vpop.permute.xlu0 %805  ;;  %v859_v30 = vsel %vm846_vm1, %v842_v1, %v566_v31  ;;  %v975_v31 = vld [vmem:[#allocation4 + $0xd8] sm:$0xff] }
 0x2ed   : > { %v800_v46 = vpop.permute.xlu1 %799 }
 0x2ee   : > { %v941_v58 = vsel %vm931_vm6, %v924_v45, %v800_v46  ;;  %v522_v12 = vpop.permute.xlu0 %521 }
 0x2ef   : > { %v998_v18 = vmul.f32 %v966_v42, %v941_v58  ;;  %v999_v47 = vmul.f32 %v967_v44, %v941_v58  ;;  %v876_v44 = vsel %vm863_vm2, %v859_v30, %v614_v54 }
 0x2f0   : > { %v893_v46 = vsel %vm880_vm3, %v876_v44, %v662_v56 }
 0x2f1   : > { %v516_v48 = vpop.permute.xlu1 %515  ;;  %v1356_v17 = vpack.c.bf16 %v999_v47, %v997_v9  ;;  %v1358_v16 = vpack.c.bf16 %v998_v18, %v996_v61  ;;  %v910_v9 = vsel %vm897_vm4, %v893_v46, %v710_v39 }
 0x2f2   : > { %v841_v19 = vsel %vm829_vm0, %v1750_v3, %v516_v48  ;;  %v570_v42 = vpop.permute.xlu0 %569  ;;  %v927_v47 = vsel %vm914_vm5, %v910_v9, %v758_v36  ;;  %v973_v48 = vld [vmem:[#allocation4 + $0xc8] sm:$0xff] }
 0x2f3   : > { %1357 = vmatprep.subr.bf16.mxu0 %v1356_v17  ;;  %v944_v17 = vsel %vm931_vm6, %v927_v47, %v806_v63 }
 0x2f4   : > { %1359 = vmatpush1.bf16.msra.mxu0 %v1358_v16  ;;  %v1004_v56 = vmul.f32 %v972_v4, %v944_v17 }
 0x2f5   : > { %v564_v62 = vpop.permute.xlu1 %563 }
 0x2f6   : > { %v858_v25 = vsel %vm846_vm1, %v841_v19, %v564_v62  ;;  %v618_v62 = vpop.permute.xlu0 %617 }
 0x2f9   : > { %v612_v21 = vpop.permute.xlu1 %611 }
 0x2fa   : > { %v875_v59 = vsel %vm863_vm2, %v858_v25, %v612_v21  ;;  %v666_v25 = vpop.permute.xlu0 %665 }
 0x2fd   : > { %v660_v55 = vpop.permute.xlu1 %659 }
 0x2fe   : > { %v892_v43 = vsel %vm880_vm3, %v875_v59, %v660_v55  ;;  %v714_v28 = vpop.permute.xlu0 %713 }
 0x301   : > { %v708_v6 = vpop.permute.xlu1 %707 }
 0x302   : > { %v909_v3 = vsel %vm897_vm4, %v892_v43, %v708_v6  ;;  %v1005_v6 = vmul.f32 %v973_v48, %v944_v17  ;;  %v762_v2 = vpop.permute.xlu0 %761  ;;  %v844_v43 = vsel %vm829_vm0, %v1772_v8, %v522_v12  ;;  %v976_v8 = vld [vmem:[#allocation4 + $0xe0] sm:$0xff] }
 0x303   : > { %v861_v32 = vsel %vm846_vm1, %v844_v43, %v570_v42 }
 0x304   : > { %v878_v27 = vsel %vm863_vm2, %v861_v32, %v618_v62 }
 0x305   : > { %v756_v26 = vpop.permute.xlu1 %755 }
 0x306   : > { %v926_v23 = vsel %vm914_vm5, %v909_v3, %v756_v26 }
 0x309   : > { %v804_v33 = vpop.permute.xlu1 %803 }
 0x30a   : > { %v943_v57 = vsel %vm931_vm6, %v926_v23, %v804_v33 }
 0x30b   : > { %v1002_v38 = vmul.f32 %v970_v50, %v943_v57  ;;  %v1003_v20 = vmul.f32 %v971_v52, %v943_v57  ;;  %v895_v50 = vsel %vm880_vm3, %v878_v27, %v666_v25  ;;  %v810_v52 = vpop.permute.xlu0 %809 }
 0x30c   : > { %v912_v57 = vsel %vm897_vm4, %v895_v50, %v714_v28 }
 0x30d   : > { %v520_v60 = vpop.permute.xlu1 %519  ;;  %v1360_v49 = vpack.c.bf16 %v1003_v20, %v1001_v37  ;;  %v1362_v15 = vpack.c.bf16 %v1002_v38, %v1000_v34  ;;  %v929_v37 = vsel %vm914_vm5, %v912_v57, %v762_v2  ;;  %v977_v20 = vld [vmem:[#allocation4 + $0xe8] sm:$0xff] }
 0x30e   : > { %v843_v45 = vsel %vm829_vm0, %v1766_v5, %v520_v60  ;;  %v974_v5 = vld [vmem:[#allocation4 + $0xd0] sm:$0xff]  ;;  %v946_v36 = vsel %vm931_vm6, %v929_v37, %v810_v52 }
 0x30f   : > { %1361 = vmatprep.subr.bf16.mxu0 %v1360_v49  ;;  %v978_v60 = vld [vmem:[#allocation4 + $0xf0] sm:$0xff]  ;;  %v979_v49 = vld [vmem:[#allocation4 + $0xf8] sm:$0xff]  ;;  %v1009_v12 = vmul.f32 %v977_v20, %v946_v36 }
 0x310   : > { %1363 = vmatpush1.bf16.msra.mxu0 %v1362_v15 }
 0x311   : > { %v568_v40 = vpop.permute.xlu1 %567 }
 0x312   : > { %v860_v58 = vsel %vm846_vm1, %v843_v45, %v568_v40 }
 0x315   : > { %v616_v7 = vpop.permute.xlu1 %615 }
 0x316   : > { %v877_v18 = vsel %vm863_vm2, %v860_v58, %v616_v7  ;;  %v1008_v7 = vmul.f32 %v976_v8, %v946_v36 }
 0x319   : > { %v664_v24 = vpop.permute.xlu1 %663 }
 0x31a   : > { %v894_v13 = vsel %vm880_vm3, %v877_v18, %v664_v24 }
 0x31d   : > { %v712_v41 = vpop.permute.xlu1 %711 }
 0x31e   : > { %v911_v16 = vsel %vm897_vm4, %v894_v13, %v712_v41 }
 0x321   : > { %v760_v61 = vpop.permute.xlu1 %759 }
 0x322   : > { %v928_v21 = vsel %vm914_vm5, %v911_v16, %v760_v61 }
 0x325   : > { %v808_v54 = vpop.permute.xlu1 %807 }
 0x326   : > { %v945_v55 = vsel %vm931_vm6, %v928_v21, %v808_v54 }
 0x327   : > { %v1006_v35 = vmul.f32 %v974_v5, %v945_v55  ;;  %v1007_v11 = vmul.f32 %v975_v31, %v945_v55 }
 0x329   : > { %v524_v14 = vpop.permute.xlu1 %523  ;;  %v1364_v19 = vpack.c.bf16 %v1007_v11, %v1005_v6  ;;  %v1366_v22 = vpack.c.bf16 %v1006_v35, %v1004_v56 }
 0x32a   : > { %v845_v3 = vsel %vm829_vm0, %v1782_v10, %v524_v14 }
 0x32b   : > { %1365 = vmatprep.subr.bf16.mxu0 %v1364_v19 }
 0x32c   : > { %1367 = vmatpush1.bf16.msra.mxu0 %v1366_v22 }
 0x32d   : > { %v572_v26 = vpop.permute.xlu1 %571 }
 0x32e   : > { %v862_v23 = vsel %vm846_vm1, %v845_v3, %v572_v26 }
 0x331   : > { %v620_v59 = vpop.permute.xlu1 %619 }
 0x332   : > { %v879_v34 = vsel %vm863_vm2, %v862_v23, %v620_v59 }
 0x335   : > { %v668_v29 = vpop.permute.xlu1 %667 }
 0x336   : > { %v896_v38 = vsel %vm880_vm3, %v879_v34, %v668_v29 }
 0x339   : > { %v716_v39 = vpop.permute.xlu1 %715 }
 0x33a   : > { %v913_v10 = vsel %vm897_vm4, %v896_v38, %v716_v39 }
 0x33d   : > { %v764_v33 = vpop.permute.xlu1 %763 }
 0x33e   : > { %v930_v15 = vsel %vm914_vm5, %v913_v10, %v764_v33 }
 0x341   : > { %v812_v40 = vpop.permute.xlu1 %811 }
 0x342   : > { %v947_v63 = vsel %vm931_vm6, %v930_v15, %v812_v40 }
 0x343   : > { %v1010_v24 = vmul.f32 %v978_v60, %v947_v63  ;;  %v1011_v41 = vmul.f32 %v979_v49, %v947_v63 }
 0x345   : > { %v1368_v1 = vpack.c.bf16 %v1011_v41, %v1009_v12  ;;  %v1370_v30 = vpack.c.bf16 %v1010_v24, %v1008_v7 }
 0x347   : > { %1369 = vmatprep.subr.bf16.mxu0 %v1368_v1 }
 0x348   : > { %1371 = vmatpush1.bf16.msra.mxu0 %v1370_v30 }
 0x34b   : > { %1077 = vmatmul.mubr.f32.vlgmr.msra.gmra.mrb[0].mxu0 %v1622_v51 }
 0x34c   : > { %1082 = vmatprep.mubr.f32.mxu0 %v1491_v0 }
 0x34f   : > { %1083 = vmatmul.mubr.f32.gmra.mrb[2].mxu0 %v1624_v53 }
 0x393   : > { %v1275_v42 = vpop.f32.mrb[4].mxu1 }
 0x394   : > { %444 = vst [vmem:[%s240_s10 + $0x8] sm:$0xff] %v1275_v42  ;;  %v434_v44 = vpop.f32.mrb[5].mxu1 }
 0x395   : > { %443 = vst [vmem:[%s240_s10] sm:$0xff] %v434_v44 }
 0x41e   : > { %v1078_v45 = vpop.f32.mrb[0].mxu0 }
 0x41f   : > { %1089 = vst [vmem:[%s235_s14] sm:$0xff] %v1078_v45  ;;  %v1080_v51 = vpop.f32.mrb[1].mxu0 }
 0x420   : > { %1090 = vst [vmem:[%s235_s14 + $0x8] sm:$0xff] %v1080_v51 }
 0x422   : > { %v1084_v0 = vpop.f32.mrb[2].mxu0 }
 0x423   : > { %1091 = vst [vmem:[%s235_s14 + $0x10] sm:$0xff] %v1084_v0  ;;  %v1086_v53 = vpop.f32.mrb[3].mxu0 }
 0x424   : > { %1092 = vst [vmem:[%s235_s14 + $0x18] sm:$0xff] %v1086_v53 }
 0x425 PF: > { %s17_s15 = sadd.s32 1, %s1483_s15  }
 0x426   : > { %p14_p9 = scmp.ge.s32.totalorder %s17_s15, 4  }
 0x428   :  { %16 = sbr.rel (!%p14_p9) target bundleno = 2 (0x2), region = 83 }
 0x42f   :  { %1130 = vsyncpa [#allocation3], 1 }
 0x430   :  { %1132 = vsyncpa [#allocation3 + $0x1], 1 }
 0x431   :  { %1133 = vsyncpa [#allocation5], 1 }

</bundles_post_ra>
